<compile_context>
chip_gen: v5e
topology: v5e:2x2
jax: 0.10.0
libtpu: 0.0.40
codegen_flags: <defaults>
</compile_context>

<pallas_src>
import functools

import jax
import jax.numpy as jnp
from jax.experimental import pallas as pl
from jax.experimental.pallas import tpu as pltpu


def _make_kernel(padding_idx: int):
    def kernel(x_ref, t_ref, batch_ref):
        # Upcast to f32 inside the kernel (inputs may be bf16 to halve HBM bytes).
        x = x_ref[...].astype(jnp.float32)   # (TN, V) logits
        t = t_ref[...].astype(jnp.float32)   # (TN, V) target probs

        # --- log-softmax row statistics (keep only (TN,1) live, no full logp tile) ---
        m = jnp.max(x, axis=1, keepdims=True)                        # (TN, 1)
        xm = x - m
        lse = jnp.log(jnp.sum(jnp.exp(xm), axis=1, keepdims=True))   # (TN, 1)

        # --- entropy term with t>0 guard (avoids log(0)) ---
        log_t = jnp.log(jnp.where(t > 0, t, jnp.float32(1.0)))       # 0 where t == 0

        # Row sums over the full tile (padding column included; subtracted below):
        #   sum_v t*(log t - logp) = sum t*log t - sum t*(x-m) + lse * sum t
        s_tlogt = jnp.sum(t * log_t, axis=1, keepdims=True)
        s_txm = jnp.sum(t * xm, axis=1, keepdims=True)
        s_t = jnp.sum(t, axis=1, keepdims=True)
        row_all = s_tlogt - s_txm + lse * s_t                        # (TN, 1)

        # --- remove the padding column's contribution (== target[:, pad] = 0) ---
        x_p = x[:, padding_idx:padding_idx + 1]                      # static slice (TN,1)
        t_p = t[:, padding_idx:padding_idx + 1]
        logp_p = (x_p - m) - lse
        log_tp = jnp.log(jnp.where(t_p > 0, t_p, jnp.float32(1.0)))
        pad_contrib = jnp.where(t_p > 0, t_p * (log_tp - logp_p), jnp.float32(0.0))

        batch_ref[...] = row_all - pad_contrib                       # (TN, 1)

    return kernel


def _choose_tile_rows(n: int, v: int, itemsize: int,
                      target_tile_bytes: int = 4 << 20, max_rows: int = 512) -> int:
    """Pick a row-tile size: multiple of 8, capped so a single input tile stays
    around a few MiB (v7x-safe with double buffering), never larger than needed."""
    rows = max(1, target_tile_bytes // max(1, v * itemsize))
    rows = min(rows, max_rows)
    rows = max(8, (rows // 8) * 8)
    n_pad8 = ((n + 7) // 8) * 8
    return min(rows, n_pad8)


@functools.partial(jax.jit, static_argnames=("size", "padding_idx"))
def cross_entropy_label_smoothing(x, target, *, size: int, padding_idx: int):
    """Pallas forward of CrossEntropyLabelSmoothing. Returns (sum_loss, batch_loss)."""
    N, V = x.shape
    assert V == size, "x.size(1) must equal self.size"
    assert target.shape == (N, V)

    itemsize = jnp.dtype(x.dtype).itemsize
    tn = _choose_tile_rows(N, V, itemsize)
    n_pad = ((N + tn - 1) // tn) * tn
    if n_pad != N:
        # Zero-padded rows contribute exactly 0 to the loss.
        x = jnp.pad(x, ((0, n_pad - N), (0, 0)))
        target = jnp.pad(target, ((0, n_pad - N), (0, 0)))

    grid = (n_pad // tn,)

    # VMEM budget: 2 inputs x 2 pipeline buffers x tile + f32 working set + headroom.
    tile_f32_bytes = tn * V * 4
    vmem_bytes = int(min(100 << 20, max(32 << 20, 10 * tile_f32_bytes)))

    cost = pl.CostEstimate(
        flops=8 * n_pad * V,
        transcendentals=2 * n_pad * V,
        bytes_accessed=2 * n_pad * V * itemsize + n_pad * 4,
    )

    batch_out = pl.pallas_call(
        _make_kernel(padding_idx),
        out_shape=jax.ShapeDtypeStruct((n_pad, 1), jnp.float32),
        grid=grid,
        in_specs=[
            pl.BlockSpec((tn, V), lambda i: (i, 0)),
            pl.BlockSpec((tn, V), lambda i: (i, 0)),
        ],
        out_specs=pl.BlockSpec((tn, 1), lambda i: (i, 0)),
        compiler_params=pltpu.CompilerParams(
            dimension_semantics=("parallel",),
            vmem_limit_bytes=vmem_bytes,
        ),
        cost_estimate=cost,
    )(x, target)

    batch_loss = batch_out[:N, 0]            # (N,)
    sum_loss = jnp.sum(batch_out)            # padded rows are exactly 0
    return sum_loss, batch_loss


def _reference(x, target, *, padding_idx: int):
    """Pure-JAX reference mirroring the PyTorch semantics."""
    logp = jax.nn.log_softmax(x.astype(jnp.float32), axis=1)
    t = target.astype(jnp.float32).at[:, padding_idx].set(0.0)
    elem = jnp.where(t > 0, t * (jnp.log(jnp.where(t > 0, t, 1.0)) - logp), 0.0)
    return jnp.sum(elem), jnp.sum(elem, axis=1)


def _check(name, x, target, padding_idx, rtol, atol):
    sum_loss, batch_loss = cross_entropy_label_smoothing(
        x, target, size=x.shape[1], padding_idx=padding_idx
    )
    jax.block_until_ready((sum_loss, batch_loss))
    ref_sum, ref_batch = _reference(x, target, padding_idx=padding_idx)
    assert batch_loss.shape == (x.shape[0],), name
    assert jnp.allclose(sum_loss, ref_sum, rtol=rtol, atol=atol), name
    assert jnp.allclose(batch_loss, ref_batch, rtol=rtol, atol=atol), name


if __name__ == "__main__":
    key = jax.random.PRNGKey(0)

    # 1) Small case (batch=8, vocab=32), f32.
    k1, k2, key = jax.random.split(key, 3)
    x = jax.random.normal(k1, (8, 32), dtype=jnp.float32)
    target = jax.nn.softmax(jax.random.normal(k2, (8, 32)), axis=1)
    _check("small_f32", x, target, padding_idx=0, rtol=1e-4, atol=1e-4)

    # 2) Ragged batch (forces row padding), non-zero padding_idx.
    k1, k2, key = jax.random.split(key, 3)
    x = jax.random.normal(k1, (37, 32), dtype=jnp.float32)
    target = jax.nn.softmax(jax.random.normal(k2, (37, 32)), axis=1)
    _check("ragged_f32", x, target, padding_idx=3, rtol=1e-4, atol=1e-4)

    # 3) Larger case exercising multiple grid steps (N=1024, V=512 -> TN=512, grid=(2,)).
    k1, k2, key = jax.random.split(key, 3)
    x = jax.random.normal(k1, (1024, 512), dtype=jnp.float32)
    target = jax.nn.softmax(jax.random.normal(k2, (1024, 512)), axis=1)
    _check("large_f32", x, target, padding_idx=0, rtol=1e-4, atol=1e-4)

    # 4) bf16 inputs (memory-bound fast path); kernel upcasts to f32 internally.
    _check("large_bf16", x.astype(jnp.bfloat16), target.astype(jnp.bfloat16),
           padding_idx=0, rtol=1e-3, atol=1e-3)

    print("KERNEL_OK")
</pallas_src>

<mosaic_0001>
module attributes {stable_mosaic.version = 11 : i64} {
  func.func @kernel(%arg0: i32, %arg1: memref<8x32xf32, #tpu.memory_space<vmem>>, %arg2: memref<8x32xf32, #tpu.memory_space<vmem>>, %arg3: memref<8x1xf32, #tpu.memory_space<vmem>>) attributes {dimension_semantics = [#tpu.dimension_semantics<parallel>], iteration_bounds = array<i64: 1>, scalar_prefetch = 0 : i64, scratch_operands = 0 : i64, tpu.core_type = #tpu.core_type<tc>, window_params = [{transform_indices = @transform_0, window_bounds = array<i64: 8, 32>}, {transform_indices = @transform_1, window_bounds = array<i64: 8, 32>}, {transform_indices = @transform_2, window_bounds = array<i64: 8, 1>}]} {
    %c0 = arith.constant 0 : index
    %c0_0 = arith.constant 0 : index
    %0 = vector.load %arg1[%c0, %c0_0] : memref<8x32xf32, #tpu.memory_space<vmem>>, vector<8x32xf32>
    %c0_1 = arith.constant 0 : index
    %c0_2 = arith.constant 0 : index
    %1 = vector.load %arg2[%c0_1, %c0_2] : memref<8x32xf32, #tpu.memory_space<vmem>>, vector<8x32xf32>
    %cst = arith.constant dense<0xFF800000> : vector<8xf32>
    %2 = vector.multi_reduction <maximumf>, %0, %cst [1] : vector<8x32xf32> to vector<8xf32>
    %3 = vector.shape_cast %2 : vector<8xf32> to vector<8x1xf32>
    %4 = vector.broadcast %3 : vector<8x1xf32> to vector<8x32xf32>
    %5 = arith.subf %0, %4 : vector<8x32xf32>
    %6 = math.exp %5 : vector<8x32xf32>
    %cst_3 = arith.constant dense<0.000000e+00> : vector<8xf32>
    %7 = vector.multi_reduction <add>, %6, %cst_3 [1] : vector<8x32xf32> to vector<8xf32>
    %8 = vector.shape_cast %7 : vector<8xf32> to vector<8x1xf32>
    %9 = math.log %8 : vector<8x1xf32>
    %cst_4 = arith.constant 0.000000e+00 : f32
    %10 = vector.broadcast %cst_4 : f32 to vector<8x32xf32>
    %11 = arith.cmpf ogt, %1, %10 : vector<8x32xf32>
    %cst_5 = arith.constant 1.000000e+00 : f32
    %12 = vector.broadcast %cst_5 : f32 to vector<8x32xf32>
    %13 = arith.select %11, %1, %12 : vector<8x32xi1>, vector<8x32xf32>
    %14 = math.log %13 : vector<8x32xf32>
    %15 = arith.mulf %1, %14 : vector<8x32xf32>
    %cst_6 = arith.constant dense<0.000000e+00> : vector<8xf32>
    %16 = vector.multi_reduction <add>, %15, %cst_6 [1] : vector<8x32xf32> to vector<8xf32>
    %17 = vector.shape_cast %16 : vector<8xf32> to vector<8x1xf32>
    %18 = arith.mulf %1, %5 : vector<8x32xf32>
    %cst_7 = arith.constant dense<0.000000e+00> : vector<8xf32>
    %19 = vector.multi_reduction <add>, %18, %cst_7 [1] : vector<8x32xf32> to vector<8xf32>
    %20 = vector.shape_cast %19 : vector<8xf32> to vector<8x1xf32>
    %cst_8 = arith.constant dense<0.000000e+00> : vector<8xf32>
    %21 = vector.multi_reduction <add>, %1, %cst_8 [1] : vector<8x32xf32> to vector<8xf32>
    %22 = vector.shape_cast %21 : vector<8xf32> to vector<8x1xf32>
    %23 = arith.subf %17, %20 : vector<8x1xf32>
    %24 = arith.mulf %9, %22 : vector<8x1xf32>
    %25 = arith.addf %23, %24 : vector<8x1xf32>
    %26 = vector.extract_strided_slice %0 {offsets = [0, 0], sizes = [8, 1], strides = [1, 1]} : vector<8x32xf32> to vector<8x1xf32>
    %27 = vector.extract_strided_slice %1 {offsets = [0, 0], sizes = [8, 1], strides = [1, 1]} : vector<8x32xf32> to vector<8x1xf32>
    %28 = arith.subf %26, %3 : vector<8x1xf32>
    %29 = arith.subf %28, %9 : vector<8x1xf32>
    %cst_9 = arith.constant 0.000000e+00 : f32
    %30 = vector.broadcast %cst_9 : f32 to vector<8x1xf32>
    %31 = arith.cmpf ogt, %27, %30 : vector<8x1xf32>
    %cst_10 = arith.constant 1.000000e+00 : f32
    %32 = vector.broadcast %cst_10 : f32 to vector<8x1xf32>
    %33 = arith.select %31, %27, %32 : vector<8x1xi1>, vector<8x1xf32>
    %34 = math.log %33 : vector<8x1xf32>
    %cst_11 = arith.constant 0.000000e+00 : f32
    %35 = vector.broadcast %cst_11 : f32 to vector<8x1xf32>
    %36 = arith.cmpf ogt, %27, %35 : vector<8x1xf32>
    %37 = arith.subf %34, %29 : vector<8x1xf32>
    %38 = arith.mulf %27, %37 : vector<8x1xf32>
    %cst_12 = arith.constant 0.000000e+00 : f32
    %39 = vector.broadcast %cst_12 : f32 to vector<8x1xf32>
    %40 = arith.select %36, %38, %39 : vector<8x1xi1>, vector<8x1xf32>
    %41 = arith.subf %25, %40 : vector<8x1xf32>
    %c0_13 = arith.constant 0 : index
    %c0_14 = arith.constant 0 : index
    %42 = vector.load %arg3[%c0_13, %c0_14] : memref<8x1xf32, #tpu.memory_space<vmem>>, vector<8x1xf32>
    tpu.vector_store %arg3[%c0_13, %c0_14], %41 {strides = array<i32>} : memref<8x1xf32, #tpu.memory_space<vmem>>, vector<8x1xf32>,
    return
  }
  func.func @transform_0(%arg0: i32) -> (i32, i32) {
    %c0_i32 = arith.constant 0 : i32
    %c0_i32_0 = arith.constant 0 : i32
    return %arg0, %c0_i32 : i32, i32
  }
  func.func @transform_1(%arg0: i32) -> (i32, i32) {
    %c0_i32 = arith.constant 0 : i32
    %c0_i32_0 = arith.constant 0 : i32
    return %arg0, %c0_i32 : i32, i32
  }
  func.func @transform_2(%arg0: i32) -> (i32, i32) {
    %c0_i32 = arith.constant 0 : i32
    %c0_i32_0 = arith.constant 0 : i32
    return %arg0, %c0_i32 : i32, i32
  }
}

</mosaic_0001>

<bundles_post_ra>
// kernel: cross_entropy_label_smoothing.1
= control target key start
LH: loop header
LB: loop body
LE: loop exit
PB: predicated region body
PF: predicated region fallthrough
CT: control target
= control target key end

     0   :  { %7 = vsyncpa [#allocation3], 0  ;;  %s177_s0 = inlined_call_operand.hbm [shape: f32[8,32], index: 0, kind: input, shape index: {}]   ;;  %s178_s1 = inlined_call_operand.hbm [shape: f32[8,32], index: 1, kind: input, shape index: {}]   ;;  %s179_s2 = inlined_call_operand.vmem [shape: f32[8,1], index: 2, kind: output, shape index: {}]  }
   0x1   :  { %s14_s11 = sshll.u32 %s177_s0, 4  ;;  %s15_s11 = int_to_ptr.hbm [resolvable:$true] %s14_s11 }
   0x2   :  { %8 = vsyncpa [#allocation5], 0  ;;  %s144_s12 = smov [#allocation2]   ;;  %s25_s16 = sshll.u32 %s178_s1, 4  ;;  %s26_s16 = int_to_ptr.hbm [resolvable:$true] %s25_s16 }
   0x3   :  { %s16_s13 = sshll.u32 %s144_s12, 4  ;;  %s145_s17 = smov [#allocation4]   ;;  %s17_s13 = int_to_ptr.vmem [resolvable:$true] %s16_s13 }
   0x4   :  { %19 = dma.hbm_to_vmem [thread:$0]  %s15_s11, 128, %s17_s13, [#allocation3]  }
   0x5   :  { %s27_s18 = sshll.u32 %s145_s17, 4  ;;  %s28_s18 = int_to_ptr.vmem [resolvable:$true] %s27_s18 }
   0x6   :  { %30 = dma.hbm_to_vmem [thread:$0]  %s26_s16, 128, %s28_s18, [#allocation5]  }
   0x7   :  { %140 = dma.done.wait [#allocation3], 128  }
   0x8   :  { %141 = vsyncadd [#allocation3], 4294967168 }
   0x9   :  { %142 = dma.done.wait [#allocation5], 128  }
   0xa   :  { %143 = vsyncadd [#allocation5], 4294967168  ;;  %vm41_vm0 = vcmask 261120   ;;  %v39_v0 = vld [vmem:[#allocation2] sm:$0xff]  ;;  %v40_v1 = vld [vmem:[#allocation4] sm:$0xff]  ;;  %vm76_vm2 = vcmask 7168  }
   0xb   :  { %v42_v2 = vsel %vm41_vm0, %v39_v0, -inf  ;;  %vm53_vm1 = vcmp.gt.f32.partialorder %v40_v1, 0.0  ;;  %v65_v8 = vsel %vm41_vm0, %v40_v1, 0.0 }
   0xc   :  { %43 = vmax.xlane.f32.xlu0 %v42_v2  ;;  %v54_v3 = vsel %vm53_vm1, %v40_v1, 1.0  ;;  %66 = vadd.xlane.f32.xlu2 %v65_v8 }
   0xd   :  { %86 = vlog2.f32 %v54_v3 }
  0x13   :  { %v87_v4 = vpop.eup %86 }
  0x14   :  { %v56_v5 = vmul.f32 0.6931472, %v87_v4 }
  0x16   :  { %v57_v6 = vmul.f32 %v56_v5, %v40_v1 }
  0x18   :  { %v58_v7 = vsel %vm41_vm0, %v57_v6, 0.0 }
  0x19   :  { %59 = vadd.xlane.f32.xlu1 %v58_v7 }
  0x7f   :  { %v44_v9 = vpop.xlane.xlu0 %43  ;;  %v67_v20 = vpop.xlane.xlu2 %66 }
  0x80   :  { %v45_v10 = vsub.f32 %v39_v0, %v44_v9 }
  0x82   :  { %v46_v11 = vmul.f32 1.442695, %v45_v10  ;;  %v61_v12 = vmul.f32 %v45_v10, %v40_v1 }
  0x84   :  { %88 = vpow2.f32 %v46_v11  ;;  %v62_v13 = vsel %vm41_vm0, %v61_v12, 0.0 }
  0x85   :  { %63 = vadd.xlane.f32.xlu1 %v62_v13 }
  0x8a   :  { %v89_v14 = vpop.eup %88 }
  0x8b   :  { %v48_v15 = vsel %vm41_vm0, %v89_v14, 0.0 }
  0x8c   :  { %49 = vadd.xlane.f32.xlu0 %v48_v15  ;;  %v60_v16 = vpop.xlane.xlu1 %59 }
  0xf8   :  { %v64_v21 = vpop.xlane.xlu1 %63 }
  0xf9   :  { %v68_v25 = vsub.f32 %v60_v16, %v64_v21 }
  0xff   :  { %v50_v17 = vpop.xlane.xlu0 %49 }
 0x100   :  { %90 = vlog2.f32 %v50_v17 }
 0x106   :  { %v91_v18 = vpop.eup %90 }
 0x107   :  { %v52_v19 = vmul.f32 0.6931472, %v91_v18 }
 0x109   :  { %v71_v22 = vsub.f32 %v45_v10, %v52_v19  ;;  %v69_v23 = vmul.f32 %v67_v20, %v52_v19 }
 0x10b   :  { %v72_v24 = vsub.f32 %v56_v5, %v71_v22  ;;  %v70_v27 = vadd.f32 %v69_v23, %v68_v25 }
 0x10d   :  { %v73_v26 = vmul.f32 %v72_v24, %v40_v1 }
 0x10f   :  { %v74_v28 = vsel %vm53_vm1, %v73_v26, 0.0 }
 0x110   :  { %v75_v29 = vsub.f32 %v70_v27, %v74_v28 }
 0x112   :  { %77 = vst.msk [vmem:[%s179_s2] sm:$0xff] %vm76_vm2, %v75_v29 }
 0x113   :  { %82 = vsyncpa [#allocation3], 1 }
 0x114   :  { %83 = vsyncpa [#allocation5], 1 }

</bundles_post_ra>
